<compile_context>
chip_gen: v5e
topology: v5e:2x2
jax: 0.10.0
libtpu: 0.0.40
codegen_flags: <defaults>
</compile_context>

<pallas_src>
import functools
import math

import jax
import jax.numpy as jnp
from jax.experimental import pallas as pl
from jax.experimental.pallas import tpu as pltpu


# ---------------------------------------------------------------------------
# Fused training-step kernel (VAE 1x1 conv -> add_noise -> UNet surrogate ->
# x0 reconstruction + per-batch SSE), one grid step per batch element.
# ---------------------------------------------------------------------------
def _fused_train_kernel(sa_ref, soma_ref, inv_sa_ref,          # SMEM (B,) scalars
                        img_ref, noise_ref, emb_ref,           # per-batch blocks
                        w_vae_ref, b_vae_ref, w_in_ref, b_in_ref,
                        w_out_ref, b_out_ref,                  # resident weights
                        pred_ref, x0_ref, sse_ref):
    b = pl.program_id(0)
    sa = sa_ref[b]
    soma = soma_ref[b]
    inv_sa = inv_sa_ref[b]

    # VAE-encode surrogate: (Clat, Cin) @ (Cin, HW); scaling factor pre-folded.
    img = img_ref[0].astype(jnp.float32)                                  # (Cin, HW)
    lat = jnp.dot(w_vae_ref[...], img,
                  preferred_element_type=jnp.float32) + b_vae_ref[...]    # (Clat, HW)

    # DDPM add_noise.
    noise = noise_ref[0].astype(jnp.float32)                              # (Clat, HW)
    noisy = sa * lat + soma * noise

    # UNet surrogate: conditioned channel-MLP (emb broadcast over HW).
    h = jnp.dot(w_in_ref[...], noisy, preferred_element_type=jnp.float32)  # (Hd, HW)
    h = h + b_in_ref[...] + emb_ref[0]
    h = h * jax.nn.sigmoid(h)                                              # SiLU
    pred = jnp.dot(w_out_ref[...], h,
                   preferred_element_type=jnp.float32) + b_out_ref[...]    # (Clat, HW)

    pred_ref[0] = pred.astype(pred_ref.dtype)
    # x0 via reciprocal multiply (no vector divide).
    x0_ref[0] = ((noisy - soma * pred) * inv_sa).astype(x0_ref.dtype)

    # epsilon-prediction MSE numerator, per-batch partial sum.
    diff = pred - noise
    part = jnp.sum(diff * diff, axis=1, keepdims=True)                     # (Clat, 1)
    sse_ref[0] = jnp.sum(part, axis=0, keepdims=True)                      # (1, 1)


def _fused_train_step(imgs_f, noise, emb, sa, soma, inv_sa,
                      w_vae_t, b_vae_c, w_in, b_in, w_out, b_out):
    B, Cin, HW = imgs_f.shape
    Clat = w_vae_t.shape[0]
    Hd = w_in.shape[0]

    smem = pl.BlockSpec(memory_space=pltpu.MemorySpace.SMEM)

    def full(shape):
        return pl.BlockSpec(shape, lambda b, _s=shape: (0,) * len(_s))

    batched = lambda c: pl.BlockSpec((1, c, HW), lambda b: (b, 0, 0))

    return pl.pallas_call(
        _fused_train_kernel,
        out_shape=(jax.ShapeDtypeStruct((B, Clat, HW), jnp.float32),   # pred
                   jax.ShapeDtypeStruct((B, Clat, HW), jnp.float32),   # x0
                   jax.ShapeDtypeStruct((B, 1, 1), jnp.float32)),      # per-batch SSE
        grid=(B,),
        in_specs=[smem, smem, smem,
                  batched(Cin),                                   # imgs
                  batched(Clat),                                  # noise
                  pl.BlockSpec((1, Hd, 1), lambda b: (b, 0, 0)),  # emb
                  full((Clat, Cin)), full((Clat, 1)),             # VAE weights
                  full((Hd, Clat)), full((Hd, 1)),                # UNet in
                  full((Clat, Hd)), full((Clat, 1))],             # UNet out
        out_specs=(batched(Clat),
                   batched(Clat),
                   pl.BlockSpec((1, 1, 1), lambda b: (b, 0, 0))),
        compiler_params=pltpu.CompilerParams(dimension_semantics=("parallel",)),
    )(sa, soma, inv_sa, imgs_f, noise, emb,
      w_vae_t, b_vae_c, w_in, b_in, w_out, b_out)


# ---------------------------------------------------------------------------
# Jitted forward implementation (conditioning / LoRA-branch math in plain JAX,
# heavy per-pixel path in the single fused Pallas kernel).
# ---------------------------------------------------------------------------
@functools.partial(jax.jit, static_argnames=("num_train_timesteps", "c_dropout"))
def _sdxl_forward(params, imgs, prompt_embeds, pooled_prompt_embeds, cs, key,
                  *, num_train_timesteps, c_dropout):
    B, Cin, H, W = imgs.shape
    HW = H * W
    Clat = params["w_vae_t"].shape[0]
    Hd = params["w_in"].shape[0]

    k_noise, k_t, k_drop = jax.random.split(key, 3)

    # ---- get_conditioning surrogate (tiny; plain JAX, not worth a pallas_call) ----
    # TODO(synk): CLIP text encoders not reproduced; prompt embeddings are inputs
    # (prompt-string dropout has no numeric analogue here).
    time_sin_dim = (params["w_cond"].shape[0]
                    - pooled_prompt_embeds.shape[-1]
                    - prompt_embeds.shape[-1] - 6)
    timesteps = jax.random.randint(k_t, (B,), 0, num_train_timesteps)
    half = time_sin_dim // 2
    freqs = jnp.exp(-math.log(10000.0) * jnp.arange(half, dtype=jnp.float32) / half)
    targs = timesteps.astype(jnp.float32)[:, None] * freqs[None, :]
    t_emb = jnp.concatenate([jnp.sin(targs), jnp.cos(targs)], axis=-1)
    add_time_ids = jnp.tile(
        jnp.array([[1024., 1024., 0., 0., 1024., 1024.]], jnp.float32), (B, 1))
    cond_in = jnp.concatenate(
        [t_emb, pooled_prompt_embeds, prompt_embeds.mean(axis=1), add_time_ids], axis=-1)
    emb = cond_in @ params["w_cond"] + params["b_cond"]
    emb = emb * jax.nn.sigmoid(emb)                       # SiLU
    emb = emb.reshape(B, Hd, 1)

    # ---- LoRA-branch loop: per-branch c-dropout -> encoder -> mapper ----
    phis = []
    if len(cs) > 0:
        drop_keys = jax.random.split(k_drop, len(cs))
        for c, dk in zip(cs, drop_keys):
            drop = jax.random.uniform(dk, (c.shape[0],)) < c_dropout
            c = jnp.where(drop[:, None], jnp.zeros_like(c), c)
            code = c @ params["w_enc"] + params["b_enc"]            # encoder
            phi = code @ params["w_map"] + params["b_map"]          # mapper
            phis.append(phi)
    # TODO(synk): phi is not routed into LoRA-adapted UNet layers (no LoRAs registered).

    # ---- DDPM scheduler scalars ----
    a_t = params["alphas_cumprod"][timesteps]
    sa = jnp.sqrt(a_t).astype(jnp.float32)
    soma = jnp.sqrt(1.0 - a_t).astype(jnp.float32)
    inv_sa = (1.0 / sa).astype(jnp.float32)

    noise = jax.random.normal(k_noise, (B, Clat, HW), jnp.float32)

    # ---- fused VAE-encode -> add_noise -> UNet -> x0 / SSE (single Pallas call) ----
    pred, x0, sse = _fused_train_step(
        imgs.reshape(B, Cin, HW).astype(jnp.float32), noise, emb,
        sa, soma, inv_sa,
        params["w_vae_t"], params["b_vae_c"],
        params["w_in"], params["b_in"], params["w_out"], params["b_out"])

    loss = jnp.sum(sse) / (B * Clat * HW)
    return (pred.reshape(B, Clat, H, W), loss, x0.reshape(B, Clat, H, W), tuple(phis))


# ---------------------------------------------------------------------------
# SDXL wrapper (forward pass of ctrloralter SDXL).
# ---------------------------------------------------------------------------
class SDXLPallas:
    NUM_TRAIN_TIMESTEPS = 1000
    VAE_SCALING_FACTOR = 0.13025       # SDXL VAE scaling factor
    C_DROPOUT = 0.05
    GUIDANCE_SCALE = 7.5

    def __init__(self, key, *, img_channels=3, latent_channels=4, hidden=32,
                 cross_dim=32, pooled_dim=32, c_dim=32, time_sin_dim=16):
        ks = jax.random.split(key, 8)
        s = 0.05
        # TODO(synk): pretrained SDXL VAE encoder replaced by a 1x1-conv surrogate.
        w_vae = s * jax.random.normal(ks[0], (img_channels, latent_channels), jnp.float32)
        b_vae = jnp.zeros((latent_channels,), jnp.float32)
        # VAE scaling factor folded into the surrogate weights (removes a full-tensor
        # elementwise pass) and transposed so the fused kernel computes
        # (Clat, Cin) @ (Cin, HW) with HW on the lane axis (lane-dense, no transposes).
        self.w_vae_t = (w_vae * self.VAE_SCALING_FACTOR).T                          # (Clat, Cin)
        self.b_vae_c = (b_vae * self.VAE_SCALING_FACTOR).reshape(latent_channels, 1)
        # conditioning projection: [t_sin | pooled | mean(prompt_embeds) | time_ids(6)] -> hidden
        cond_in_dim = time_sin_dim + pooled_dim + cross_dim + 6
        self.w_cond = s * jax.random.normal(ks[1], (cond_in_dim, hidden), jnp.float32)
        self.b_cond = jnp.zeros((hidden,), jnp.float32)
        # UNet surrogate params
        # TODO(synk): the real diffusers SDXL UNet2DConditionModel (with LoRA-adapted
        # attn/conv layers) cannot be reproduced here; small conditioned channel-MLP
        # stand-in keeps the (noisy_latents, timestep, conditioning) -> pred API.
        self.w_in = s * jax.random.normal(ks[2], (hidden, latent_channels), jnp.float32)
        self.b_in = jnp.zeros((hidden, 1), jnp.float32)
        self.w_out = s * jax.random.normal(ks[3], (latent_channels, hidden), jnp.float32)
        self.b_out = jnp.zeros((latent_channels, 1), jnp.float32)
        # LoRA-branch encoder + mapper (predict_phi path)
        self.w_enc = s * jax.random.normal(ks[4], (c_dim, c_dim), jnp.float32)
        self.b_enc = jnp.zeros((c_dim,), jnp.float32)
        self.w_map = s * jax.random.normal(ks[5], (c_dim, c_dim), jnp.float32)
        self.b_map = jnp.zeros((c_dim,), jnp.float32)
        self.hidden = hidden
        # DDPMScheduler (SDXL): scaled_linear betas, epsilon prediction
        betas = jnp.linspace(0.00085 ** 0.5, 0.012 ** 0.5,
                             self.NUM_TRAIN_TIMESTEPS, dtype=jnp.float32) ** 2
        self.alphas_cumprod = jnp.cumprod(1.0 - betas)
        self._dp_batches = []              # DataProvider.set_batch targets

    def _params(self):
        return dict(w_vae_t=self.w_vae_t, b_vae_c=self.b_vae_c,
                    w_cond=self.w_cond, b_cond=self.b_cond,
                    w_in=self.w_in, b_in=self.b_in,
                    w_out=self.w_out, b_out=self.b_out,
                    w_enc=self.w_enc, b_enc=self.b_enc,
                    w_map=self.w_map, b_map=self.b_map,
                    alphas_cumprod=self.alphas_cumprod)

    def forward(self, imgs, prompt_embeds, pooled_prompt_embeds, cs, key):
        assert imgs.ndim == 4
        # TODO(synk): imgs-in-[-1,1] value assert moved to the caller — calling
        # float(imgs.min()/max()) here forces a host sync and breaks jit tracing.
        pred, loss, x0, phis = _sdxl_forward(
            self._params(), imgs, prompt_embeds, pooled_prompt_embeds,
            tuple(cs), key,
            num_train_timesteps=self.NUM_TRAIN_TIMESTEPS,
            c_dropout=self.C_DROPOUT)
        self._dp_batches = list(phis)      # DataProvider.set_batch per branch
        return pred, loss, x0


if __name__ == "__main__":
    key = jax.random.PRNGKey(0)
    k_param, k_img, k_pe, k_pp, k_c, k_fwd = jax.random.split(key, 6)

    model = SDXLPallas(k_param)

    B, H, W = 2, 16, 16
    imgs = jnp.tanh(jax.random.normal(k_img, (B, 3, H, W), jnp.float32))   # in [-1, 1]
    prompt_embeds = jax.random.normal(k_pe, (B, 8, 32), jnp.float32)       # (B, seq, hidden)
    pooled_prompt_embeds = jax.random.normal(k_pp, (B, 32), jnp.float32)
    cs = [jax.random.normal(k_c, (B, 32), jnp.float32)]

    model_pred, loss, x0 = model.forward(imgs, prompt_embeds, pooled_prompt_embeds, cs, k_fwd)
    jax.block_until_ready((model_pred, loss, x0))

    assert model_pred.shape == (B, 4, H, W)
    assert x0.shape == (B, 4, H, W)
    assert loss.shape == ()
    print("KERNEL_OK")
</pallas_src>

<mosaic_0001>
module attributes {stable_mosaic.version = 11 : i64} {
  func.func @_fused_train_kernel(%arg0: i32, %arg1: memref<2xf32, #tpu.memory_space<smem>>, %arg2: memref<2xf32, #tpu.memory_space<smem>>, %arg3: memref<2xf32, #tpu.memory_space<smem>>, %arg4: memref<1x3x256xf32, #tpu.memory_space<vmem>>, %arg5: memref<1x4x256xf32, #tpu.memory_space<vmem>>, %arg6: memref<1x32x1xf32, #tpu.memory_space<vmem>>, %arg7: memref<4x3xf32, #tpu.memory_space<vmem>>, %arg8: memref<4x1xf32, #tpu.memory_space<vmem>>, %arg9: memref<32x4xf32, #tpu.memory_space<vmem>>, %arg10: memref<32x1xf32, #tpu.memory_space<vmem>>, %arg11: memref<4x32xf32, #tpu.memory_space<vmem>>, %arg12: memref<4x1xf32, #tpu.memory_space<vmem>>, %arg13: memref<1x4x256xf32, #tpu.memory_space<vmem>>, %arg14: memref<1x4x256xf32, #tpu.memory_space<vmem>>, %arg15: memref<1x1x1xf32, #tpu.memory_space<vmem>>) attributes {dimension_semantics = [#tpu.dimension_semantics<parallel>], iteration_bounds = array<i64: 2>, scalar_prefetch = 0 : i64, scratch_operands = 0 : i64, tpu.core_type = #tpu.core_type<tc>, window_params = [{transform_indices = @transform_0, window_bounds = array<i64: 2>}, {transform_indices = @transform_1, window_bounds = array<i64: 2>}, {transform_indices = @transform_2, window_bounds = array<i64: 2>}, {transform_indices = @transform_3, window_bounds = array<i64: 1, 3, 256>}, {transform_indices = @transform_4, window_bounds = array<i64: 1, 4, 256>}, {transform_indices = @transform_5, window_bounds = array<i64: 1, 32, 1>}, {pipeline_mode = #tpu.pipeline_mode<synchronous>, transform_indices = @transform_6, window_bounds = array<i64: 4, 3>}, {pipeline_mode = #tpu.pipeline_mode<synchronous>, transform_indices = @transform_7, window_bounds = array<i64: 4, 1>}, {pipeline_mode = #tpu.pipeline_mode<synchronous>, transform_indices = @transform_8, window_bounds = array<i64: 32, 4>}, {pipeline_mode = #tpu.pipeline_mode<synchronous>, transform_indices = @transform_9, window_bounds = array<i64: 32, 1>}, {pipeline_mode = #tpu.pipeline_mode<synchronous>, transform_indices = @transform_10, window_bounds = array<i64: 4, 32>}, {pipeline_mode = #tpu.pipeline_mode<synchronous>, transform_indices = @transform_11, window_bounds = array<i64: 4, 1>}, {transform_indices = @transform_12, window_bounds = array<i64: 1, 4, 256>}, {transform_indices = @transform_13, window_bounds = array<i64: 1, 4, 256>}, {transform_indices = @transform_14, window_bounds = array<i64: 1, 1, 1>}]} {
    %0 = arith.index_cast %arg0 : i32 to index
    %1 = memref.load %arg1[%0] : memref<2xf32, #tpu.memory_space<smem>>
    %2 = arith.index_cast %arg0 : i32 to index
    %3 = memref.load %arg2[%2] : memref<2xf32, #tpu.memory_space<smem>>
    %4 = arith.index_cast %arg0 : i32 to index
    %5 = memref.load %arg3[%4] : memref<2xf32, #tpu.memory_space<smem>>
    %c0 = arith.constant 0 : index
    %c0_0 = arith.constant 0 : index
    %c0_1 = arith.constant 0 : index
    %6 = vector.load %arg4[%c0, %c0_0, %c0_1] : memref<1x3x256xf32, #tpu.memory_space<vmem>>, vector<1x3x256xf32>
    %7 = vector.shape_cast %6 : vector<1x3x256xf32> to vector<3x256xf32>
    %c0_2 = arith.constant 0 : index
    %c0_3 = arith.constant 0 : index
    %8 = vector.load %arg7[%c0_2, %c0_3] : memref<4x3xf32, #tpu.memory_space<vmem>>, vector<4x3xf32>
    %cst = arith.constant dense<0.000000e+00> : vector<4x256xf32>
    %9 = tpu.matmul %8, %7, %cst {dimension_numbers = #tpu.dot_dimension_numbers<[1], [0], [0], [1], [0, 0, 1, 1], [], []>} : vector<4x3xf32>, vector<3x256xf32>, vector<4x256xf32> -> vector<4x256xf32>
    %c0_4 = arith.constant 0 : index
    %c0_5 = arith.constant 0 : index
    %10 = vector.load %arg8[%c0_4, %c0_5] : memref<4x1xf32, #tpu.memory_space<vmem>>, vector<4x1xf32>
    %11 = vector.broadcast %10 : vector<4x1xf32> to vector<4x256xf32>
    %12 = arith.addf %9, %11 : vector<4x256xf32>
    %c0_6 = arith.constant 0 : index
    %c0_7 = arith.constant 0 : index
    %c0_8 = arith.constant 0 : index
    %13 = vector.load %arg5[%c0_6, %c0_7, %c0_8] : memref<1x4x256xf32, #tpu.memory_space<vmem>>, vector<1x4x256xf32>
    %14 = vector.shape_cast %13 : vector<1x4x256xf32> to vector<4x256xf32>
    %15 = vector.broadcast %1 : f32 to vector<4x256xf32>
    %16 = arith.mulf %15, %12 : vector<4x256xf32>
    %17 = vector.broadcast %3 : f32 to vector<4x256xf32>
    %18 = arith.mulf %17, %14 : vector<4x256xf32>
    %19 = arith.addf %16, %18 : vector<4x256xf32>
    %c0_9 = arith.constant 0 : index
    %c0_10 = arith.constant 0 : index
    %20 = vector.load %arg9[%c0_9, %c0_10] : memref<32x4xf32, #tpu.memory_space<vmem>>, vector<32x4xf32>
    %cst_11 = arith.constant dense<0.000000e+00> : vector<32x256xf32>
    %21 = tpu.matmul %20, %19, %cst_11 {dimension_numbers = #tpu.dot_dimension_numbers<[1], [0], [0], [1], [0, 0, 1, 1], [], []>} : vector<32x4xf32>, vector<4x256xf32>, vector<32x256xf32> -> vector<32x256xf32>
    %c0_12 = arith.constant 0 : index
    %c0_13 = arith.constant 0 : index
    %22 = vector.load %arg10[%c0_12, %c0_13] : memref<32x1xf32, #tpu.memory_space<vmem>>, vector<32x1xf32>
    %23 = vector.broadcast %22 : vector<32x1xf32> to vector<32x256xf32>
    %24 = arith.addf %21, %23 : vector<32x256xf32>
    %c0_14 = arith.constant 0 : index
    %c0_15 = arith.constant 0 : index
    %c0_16 = arith.constant 0 : index
    %25 = vector.load %arg6[%c0_14, %c0_15, %c0_16] : memref<1x32x1xf32, #tpu.memory_space<vmem>>, vector<1x32x1xf32>
    %26 = vector.shape_cast %25 : vector<1x32x1xf32> to vector<32x1xf32>
    %27 = vector.broadcast %26 : vector<32x1xf32> to vector<32x256xf32>
    %28 = arith.addf %24, %27 : vector<32x256xf32>
    %29 = arith.negf %28 : vector<32x256xf32>
    %30 = math.exp %29 : vector<32x256xf32>
    %cst_17 = arith.constant 1.000000e+00 : f32
    %31 = vector.broadcast %cst_17 : f32 to vector<32x256xf32>
    %32 = arith.addf %31, %30 : vector<32x256xf32>
    %33 = arith.divf %31, %32 : vector<32x256xf32>
    %34 = arith.mulf %28, %33 : vector<32x256xf32>
    %c0_18 = arith.constant 0 : index
    %c0_19 = arith.constant 0 : index
    %35 = vector.load %arg11[%c0_18, %c0_19] : memref<4x32xf32, #tpu.memory_space<vmem>>, vector<4x32xf32>
    %cst_20 = arith.constant dense<0.000000e+00> : vector<4x256xf32>
    %36 = tpu.matmul %35, %34, %cst_20 {dimension_numbers = #tpu.dot_dimension_numbers<[1], [0], [0], [1], [0, 0, 1, 1], [], []>} : vector<4x32xf32>, vector<32x256xf32>, vector<4x256xf32> -> vector<4x256xf32>
    %c0_21 = arith.constant 0 : index
    %c0_22 = arith.constant 0 : index
    %37 = vector.load %arg12[%c0_21, %c0_22] : memref<4x1xf32, #tpu.memory_space<vmem>>, vector<4x1xf32>
    %38 = vector.broadcast %37 : vector<4x1xf32> to vector<4x256xf32>
    %39 = arith.addf %36, %38 : vector<4x256xf32>
    %c0_23 = arith.constant 0 : index
    %c0_24 = arith.constant 0 : index
    %c0_25 = arith.constant 0 : index
    %40 = vector.load %arg13[%c0_23, %c0_24, %c0_25] : memref<1x4x256xf32, #tpu.memory_space<vmem>>, vector<1x4x256xf32>
    %41 = vector.shape_cast %40 : vector<1x4x256xf32> to vector<4x256xf32>
    %42 = vector.shape_cast %39 : vector<4x256xf32> to vector<1x4x256xf32>
    tpu.vector_store %arg13[%c0_23, %c0_24, %c0_25], %42 {strides = array<i32>} : memref<1x4x256xf32, #tpu.memory_space<vmem>>, vector<1x4x256xf32>,
    %43 = vector.broadcast %3 : f32 to vector<4x256xf32>
    %44 = arith.mulf %43, %39 : vector<4x256xf32>
    %45 = arith.subf %19, %44 : vector<4x256xf32>
    %46 = vector.broadcast %5 : f32 to vector<4x256xf32>
    %47 = arith.mulf %45, %46 : vector<4x256xf32>
    %c0_26 = arith.constant 0 : index
    %c0_27 = arith.constant 0 : index
    %c0_28 = arith.constant 0 : index
    %48 = vector.load %arg14[%c0_26, %c0_27, %c0_28] : memref<1x4x256xf32, #tpu.memory_space<vmem>>, vector<1x4x256xf32>
    %49 = vector.shape_cast %48 : vector<1x4x256xf32> to vector<4x256xf32>
    %50 = vector.shape_cast %47 : vector<4x256xf32> to vector<1x4x256xf32>
    tpu.vector_store %arg14[%c0_26, %c0_27, %c0_28], %50 {strides = array<i32>} : memref<1x4x256xf32, #tpu.memory_space<vmem>>, vector<1x4x256xf32>,
    %51 = arith.subf %39, %14 : vector<4x256xf32>
    %52 = arith.mulf %51, %51 : vector<4x256xf32>
    %cst_29 = arith.constant dense<0.000000e+00> : vector<4xf32>
    %53 = vector.multi_reduction <add>, %52, %cst_29 [1] : vector<4x256xf32> to vector<4xf32>
    %54 = vector.shape_cast %53 : vector<4xf32> to vector<4x1xf32>
    %cst_30 = arith.constant dense<0.000000e+00> : vector<1xf32>
    %55 = vector.multi_reduction <add>, %54, %cst_30 [0] : vector<4x1xf32> to vector<1xf32>
    %56 = vector.shape_cast %55 : vector<1xf32> to vector<1x1xf32>
    %c0_31 = arith.constant 0 : index
    %c0_32 = arith.constant 0 : index
    %c0_33 = arith.constant 0 : index
    %57 = vector.load %arg15[%c0_31, %c0_32, %c0_33] : memref<1x1x1xf32, #tpu.memory_space<vmem>>, vector<1x1x1xf32>
    %58 = vector.shape_cast %57 : vector<1x1x1xf32> to vector<1x1xf32>
    %59 = vector.shape_cast %56 : vector<1x1xf32> to vector<1x1x1xf32>
    tpu.vector_store %arg15[%c0_31, %c0_32, %c0_33], %59 {strides = array<i32>} : memref<1x1x1xf32, #tpu.memory_space<vmem>>, vector<1x1x1xf32>,
    return
  }
  func.func @transform_0(%arg0: i32) -> i32 {
    %c0_i32 = arith.constant 0 : i32
    %c0_i32_0 = arith.constant 0 : i32
    return %c0_i32 : i32
  }
  func.func @transform_1(%arg0: i32) -> i32 {
    %c0_i32 = arith.constant 0 : i32
    %c0_i32_0 = arith.constant 0 : i32
    return %c0_i32 : i32
  }
  func.func @transform_2(%arg0: i32) -> i32 {
    %c0_i32 = arith.constant 0 : i32
    %c0_i32_0 = arith.constant 0 : i32
    return %c0_i32 : i32
  }
  func.func @transform_3(%arg0: i32) -> (i32, i32, i32) {
    %c0_i32 = arith.constant 0 : i32
    %c0_i32_0 = arith.constant 0 : i32
    %c0_i32_1 = arith.constant 0 : i32
    return %arg0, %c0_i32, %c0_i32_0 : i32, i32, i32
  }
  func.func @transform_4(%arg0: i32) -> (i32, i32, i32) {
    %c0_i32 = arith.constant 0 : i32
    %c0_i32_0 = arith.constant 0 : i32
    %c0_i32_1 = arith.constant 0 : i32
    return %arg0, %c0_i32, %c0_i32_0 : i32, i32, i32
  }
  func.func @transform_5(%arg0: i32) -> (i32, i32, i32) {
    %c0_i32 = arith.constant 0 : i32
    %c0_i32_0 = arith.constant 0 : i32
    %c0_i32_1 = arith.constant 0 : i32
    return %arg0, %c0_i32, %c0_i32_0 : i32, i32, i32
  }
  func.func @transform_6(%arg0: i32) -> (i32, i32) {
    %c0_i32 = arith.constant 0 : i32
    %c0_i32_0 = arith.constant 0 : i32
    %c0_i32_1 = arith.constant 0 : i32
    return %c0_i32, %c0_i32_0 : i32, i32
  }
  func.func @transform_7(%arg0: i32) -> (i32, i32) {
    %c0_i32 = arith.constant 0 : i32
    %c0_i32_0 = arith.constant 0 : i32
    %c0_i32_1 = arith.constant 0 : i32
    return %c0_i32, %c0_i32_0 : i32, i32
  }
  func.func @transform_8(%arg0: i32) -> (i32, i32) {
    %c0_i32 = arith.constant 0 : i32
    %c0_i32_0 = arith.constant 0 : i32
    %c0_i32_1 = arith.constant 0 : i32
    return %c0_i32, %c0_i32_0 : i32, i32
  }
  func.func @transform_9(%arg0: i32) -> (i32, i32) {
    %c0_i32 = arith.constant 0 : i32
    %c0_i32_0 = arith.constant 0 : i32
    %c0_i32_1 = arith.constant 0 : i32
    return %c0_i32, %c0_i32_0 : i32, i32
  }
  func.func @transform_10(%arg0: i32) -> (i32, i32) {
    %c0_i32 = arith.constant 0 : i32
    %c0_i32_0 = arith.constant 0 : i32
    %c0_i32_1 = arith.constant 0 : i32
    return %c0_i32, %c0_i32_0 : i32, i32
  }
  func.func @transform_11(%arg0: i32) -> (i32, i32) {
    %c0_i32 = arith.constant 0 : i32
    %c0_i32_0 = arith.constant 0 : i32
    %c0_i32_1 = arith.constant 0 : i32
    return %c0_i32, %c0_i32_0 : i32, i32
  }
  func.func @transform_12(%arg0: i32) -> (i32, i32, i32) {
    %c0_i32 = arith.constant 0 : i32
    %c0_i32_0 = arith.constant 0 : i32
    %c0_i32_1 = arith.constant 0 : i32
    return %arg0, %c0_i32, %c0_i32_0 : i32, i32, i32
  }
  func.func @transform_13(%arg0: i32) -> (i32, i32, i32) {
    %c0_i32 = arith.constant 0 : i32
    %c0_i32_0 = arith.constant 0 : i32
    %c0_i32_1 = arith.constant 0 : i32
    return %arg0, %c0_i32, %c0_i32_0 : i32, i32, i32
  }
  func.func @transform_14(%arg0: i32) -> (i32, i32, i32) {
    %c0_i32 = arith.constant 0 : i32
    %c0_i32_0 = arith.constant 0 : i32
    %c0_i32_1 = arith.constant 0 : i32
    return %arg0, %c0_i32, %c0_i32_0 : i32, i32, i32
  }
}

</mosaic_0001>

<bundles_post_ra>
// kernel: _sdxl_forward.5
= control target key start
LH: loop header
LB: loop body
LE: loop exit
PB: predicated region body
PF: predicated region fallthrough
CT: control target
= control target key end

     0   :  { %20 = vsyncpa [#allocation3], 0  ;;  %s1840_s0 = inlined_call_operand.vmem [shape: f32[2], index: 0, kind: input, shape index: {}]   ;;  %s1841_s1 = inlined_call_operand.vmem [shape: f32[2], index: 1, kind: input, shape index: {}]   ;;  %s1842_s2 = inlined_call_operand.vmem [shape: f32[2], index: 2, kind: input, shape index: {}]   ;;  %s1843_s3 = inlined_call_operand.vmem [shape: f32[2,3,256], index: 3, kind: input, shape index: {}]   ;;  %s1844_s4 = inlined_call_operand.vmem [shape: f32[2,4,256], index: 4, kind: input, shape index: {}]   ;;  %s1845_s5 = inlined_call_operand.vmem [shape: f32[2,32,1], index: 5, kind: input, shape index: {}]   ;;  %s1846_s6 = inlined_call_operand.vmem [shape: f32[4,3], index: 6, kind: input, shape index: {}]   ;;  %s1847_s7 = inlined_call_operand.vmem [shape: f32[4,1], index: 7, kind: input, shape index: {}]   ;;  %s1848_s8 = inlined_call_operand.vmem [shape: f32[32,4], index: 8, kind: input, shape index: {}]   ;;  %s1849_s9 = inlined_call_operand.vmem [shape: f32[32,1], index: 9, kind: input, shape index: {}]   ;;  %s1850_s10 = inlined_call_operand.vmem [shape: f32[4,32], index: 10, kind: input, shape index: {}]   ;;  %s1851_s11 = inlined_call_operand.vmem [shape: f32[4,1], index: 11, kind: input, shape index: {}]   ;;  %s1852_s12 = inlined_call_operand.vmem [shape: f32[2,4,256], index: 12, kind: output, shape index: {0}]   ;;  %s1853_s13 = inlined_call_operand.vmem [shape: f32[2,4,256], index: 13, kind: output, shape index: {1}]   ;;  %s1854_s14 = inlined_call_operand.vmem [shape: f32[2,1,1], index: 14, kind: output, shape index: {2}]  }
   0x1   :  { %21 = vsyncpa [#allocation5], 0  ;;  %s1475_s29 = smov 0  }
   0x2 LB: > { %s1481_s30 = sadd.s32 4294967295, %s1394_s29   ;;  %p1208_p0 = scmp.ge.s32.totalorder %s1394_s29, 1  ;;  %s1394_s29 = sphi %s1475_s29, %s27_s29  }
   0x3   : > { %p377_p1 = scmp.lt.s32.totalorder %s1394_s29, 3  ;;  %s399_s17 = sshll.u32 %s1841_s1, 4  ;;  %s400_s17 = int_to_ptr.vmem [resolvable:$true] %s399_s17 }
   0x4   : > { %p1282_p3 = scmp.eq.s32.totalorder %s1481_s30, 0  ;;  %s389_s21 = sshll.u32 %s1840_s0, 4  ;;  %s390_s21 = int_to_ptr.vmem [resolvable:$true] %s389_s21 }
   0x5   : > { %p1488_p2 = pnand %p1208_p0, %p377_p1  ;;  %s409_s24 = sshll.u32 %s1842_s2, 4  ;;  %s410_s24 = int_to_ptr.vmem [resolvable:$true] %s409_s24 }
   0x6   : > { %s1396_s25 = smov [#allocation4]   ;;  %s1397_s26 = smov [#allocation2]  }
   0x7   : > { %p1272_p4 = pneg %p1488_p2  ;;  %s1398_s27 = smov [#allocation6]  }
   0x9   : > { %p1273_p5 = pnand %p1282_p3, %p1272_p4  ;;  %464 = sbr.rel (%p1488_p2) target bundleno = 625 (0x271), region = 68 }
   0xb   : > { %1278 = dma.vmem_to_smem (!%p1273_p5), %s400_s17, 16, %s1396_s25, [#allocation5]  }
   0xc   : > { %1275 = dma.vmem_to_smem (!%p1273_p5), %s390_s21, 16, %s1397_s26, [#allocation3]  }
   0xd   : > { %1281 = dma.vmem_to_smem (!%p1273_p5), %s410_s24, 16, %s1398_s27, [#allocation5]  }
   0xe   : > { %1385 = dma.done.wait (%p1282_p3), [#allocation3], 16  }
   0xf   : > { %1387 = vsyncadd (%p1282_p3), [#allocation3], 4294967280 }
  0x10   : > { %1389 = dma.done.wait (%p1282_p3), [#allocation5], 32  }
  0x11   : > { %1391 = vsyncadd (%p1282_p3), [#allocation5], 4294967264 }
  0x12   : > { %481 = sfence }
  0x13   : > { %v573_v0 = vld [vmem:[%s1847_s7] sm:$0xf]  ;;  %p540_p6 = scmp.lt.s32.totalorder %s1481_s30, 1  ;;  %v1399_v1 = vmov 0   ;;  %s569_s16 = sld [smem:[#allocation4 + %s1481_s30]]  ;;  %v653_v3 = vld [vmem:[%s1849_s9 + $0x18] sm:$0xff] }
  0x14   : > { %1300 = vset.pattern.permute.xlu0 %v1399_v1  ;;  %1301 = vset.pattern.permute.xlu1 %v1399_v1  ;;  %vm587_vm0 = vcmask 1042432   ;;  %v572_v7 = vld [vmem:[%s1846_s6] sm:$0xf]  ;;  %vm583_vm1 = vcmask 23552   ;;  %v652_v14 = vld [vmem:[%s1849_s9 + $0x10] sm:$0xff]  ;;  %s568_s27 = sld [smem:[#allocation2 + %s1481_s30]] }
  0x15   : > { %576 = vperm.xlu0 %1300, %v573_v0   ;;  %s1519_s17 = scalar_select %p540_p6, %s1481_s30, 1  ;;  %1302 = vset.pattern.permute.xlu2 %v1399_v1  ;;  %v650_v10 = vld [vmem:[%s1849_s9] sm:$0xff]  ;;  %v651_v17 = vld [vmem:[%s1849_s9 + $0x8] sm:$0xff]  ;;  %vm1855_vm2 = vcmask 1043456   ;;  %vm674_vm3 = vcmask 31744   ;;  %v648_v32 = vld [vmem:[%s1848_s8 + $0x10] sm:$0xff] }
  0x16   : > { %v945_v11 = vld [vmem:[%s1851_s11] sm:$0xf]  ;;  %666 = vperm.xlu1 %1301, %v652_v14   ;;  %661 = vperm.xlu2 %1302, %v651_v17   ;;  %v647_v30 = vld [vmem:[%s1848_s8 + $0x8] sm:$0xff]  ;;  %v649_v33 = vld [vmem:[%s1848_s8 + $0x18] sm:$0xff]  ;;  %s570_s28 = sld [smem:[#allocation6 + %s1481_s30]] }
  0x17   : > { %s1522_s18 = sshll.u32 %s1519_s17, 3  ;;  %s1255_s23 = sshll.u32 %s1519_s17, 5  ;;  %v646_v29 = vld [vmem:[%s1848_s8] sm:$0xff] }
  0x18   : > { %s544_s21 = scalar_lea.vmem %s1843_s3, %s1522_s18  ;;  %s549_s24 = scalar_lea.vmem %s1844_s4, %s1522_s18 }
  0x19   : > { %v571_v2 = vld [vmem:[%s544_s21] sm:$0x77]  ;;  %v1535_v5 = vstv %s569_s16  ;;  %s554_s26 = scalar_lea.vmem %s1845_s5, %s1255_s23  ;;  %s559_s16 = scalar_lea.vmem %s1852_s12, %s1522_s18 }
  0x1a   : > { %580 = vst [vmem:[#allocation1] ss:$2 sm:$0xff] %v571_v2  ;;  %v632_v4 = vld [vmem:[%s549_s24] sm:$0xff]  ;;  %v755_v15 = vld [vmem:[%s554_s26 + $0x18] sm:$0xff]  ;;  %v753_v16 = vld [vmem:[%s554_s26 + $0x8] sm:$0xff]  ;;  %v633_v20 = vstv %s568_s27  ;;  %s564_s21 = scalar_lea.vmem %s1853_s13, %s1522_s18  ;;  %s567_s24 = scalar_lea.vmem %s1854_s14, %s1519_s17 }
  0x1b   : > { %v637_v6 = vmul.f32 %v1535_v5, %v632_v4  ;;  %v754_v22 = vld [vmem:[%s554_s26 + $0x10] sm:$0xff]  ;;  %v752_v31 = vld [vmem:[%s554_s26] sm:$0xff] }
  0x1d   : > { %671 = vperm.xlu0 %1300, %v653_v3  }
  0x1e   : > { %773 = vperm.xlu1 %1301, %v755_v15   ;;  %768 = vperm.xlu2 %1302, %v754_v22  }
  0x21   : > { %v581_v8 = vld.sshfl [vmem:[#allocation1] sm:$0xff pattern:$0x75316420]  ;;  %v582_v9 = vld.sshfl [vmem:[#allocation1 + $0x8] sm:$0xff pattern:$0x75316420] }
  0x22   : > { %1227 = vmatpush.msk.msra.mxu0 %vm587_vm0, %v581_v8  ;;  %1229 = vmatpush.msk.msra.mxu1 %vm587_vm0, %v582_v9  ;;  %639 = vst [vmem:[#allocation1] ss:$2 sm:$0xff] %v637_v6 }
  0x23   : > { %1228 = vmatmul.msk.f32.vlgmr.msra.gmra.mxu0 %vm583_vm1, %v572_v7  ;;  %1230 = vmatmul.msk.f32.vlgmr.msra.gmra.mxu1 %vm583_vm1, %v572_v7 }
  0x25   : > { %656 = vperm.xlu0 %1300, %v650_v10  }
  0x26   : > { %763 = vperm.xlu1 %1301, %v753_v16   ;;  %758 = vperm.xlu2 %1302, %v752_v31  }
  0x29   : > { %v640_v12 = vld.sshfl [vmem:[#allocation1] sm:$0xff pattern:$0x75316420]  ;;  %v641_v13 = vld.sshfl [vmem:[#allocation1 + $0x8] sm:$0xff pattern:$0x75316420] }
  0x2a   : > { %1015 = vst [vmem:[#allocation1] ss:$2 sm:$0xff] %v632_v4 }
  0x2d   : > { %948 = vperm.xlu0 %1300, %v945_v11  }
  0x70   : > { %v662_v34 = vpop.permute.xlu2 %661 }
  0x78   : > { %v769_v37 = vpop.permute.xlu2 %768 }
  0x80   : > { %v759_v41 = vpop.permute.xlu2 %758 }
  0x87   : > { %v577_v18 = vpop.permute.xlu0 %576 }
  0x88   : > { %v667_v35 = vpop.permute.xlu1 %666 }
  0x8f   : > { %v672_v36 = vpop.permute.xlu0 %671 }
  0x90   : > { %v774_v38 = vpop.permute.xlu1 %773 }
  0x97   : > { %v657_v39 = vpop.permute.xlu0 %656 }
  0x98   : > { %v764_v48 = vpop.permute.xlu1 %763 }
  0xa0   : > { %v609_v19 = vpop.f32.mrf.mxu0  ;;  %v629_v21 = vpop.f32.mrf.mxu1 }
  0xa1   : > { %v610_v23 = vadd.f32 %v609_v19, %v577_v18  ;;  %v630_v24 = vadd.f32 %v629_v21, %v577_v18 }
  0xa3   : > { %v634_v25 = vmul.f32 %v633_v20, %v610_v23  ;;  %v635_v26 = vmul.f32 %v633_v20, %v630_v24 }
  0xa5   : > { %v1558_v27 = vadd.f32 %v640_v12, %v634_v25  ;;  %v1560_v28 = vadd.f32 %v641_v13, %v635_v26 }
  0xa7   : > { %1231 = vmatpush.msk.msrb.mxu0 %vm1855_vm2, %v1558_v27  ;;  %1258 = vmatpush.msk.msra.mxu2 %vm1855_vm2, %v1558_v27 }
  0xa8   : > { %1236 = vmatpush.msk.msrb.mxu1 %vm1855_vm2, %v1560_v28  ;;  %1259 = vmatpush.msk.msra.mxu3 %vm1855_vm2, %v1560_v28 }
  0xa9   : > { %1232 = vmatmul.msk.f32.vlgmr.msrb.gmra.mxu0 %vm674_vm3, %v646_v29  ;;  %1233 = vmatmul.msk.f32.vlgmr.msra.gmra.mxu2 %vm674_vm3, %v647_v30 }
  0xaa   : > { %1237 = vmatmul.msk.f32.vlgmr.msrb.gmra.mxu1 %vm674_vm3, %v646_v29  ;;  %1238 = vmatmul.msk.f32.vlgmr.msra.gmra.mxu3 %vm674_vm3, %v647_v30 }
  0xb1   : > { %1234 = vmatmul.msk.f32.gmra.mxu2 %vm674_vm3, %v648_v32 }
  0xb2   : > { %1239 = vmatmul.msk.f32.gmra.mxu3 %vm674_vm3, %v648_v32 }
  0xb9   : > { %1235 = vmatmul.msk.f32.gmra.mxu2 %vm674_vm3, %v649_v33 }
  0xba   : > { %1240 = vmatmul.msk.f32.gmra.mxu3 %vm674_vm3, %v649_v33 }
 0x126   : > { %v711_v40 = vpop.f32.mrf.mxu0 }
 0x127   : > { %v712_v42 = vadd.f32 %v711_v40, %v657_v39  ;;  %v740_v43 = vpop.f32.mrf.mxu1 }
 0x128   : > { %v741_v44 = vadd.f32 %v740_v43, %v657_v39 }
 0x129   : > { %v1590_v45 = vadd.f32 %v759_v41, %v712_v42 }
 0x12a   : > { %v1592_v46 = vadd.f32 %v759_v41, %v741_v44 }
 0x12b   : > { %v1241_v49 = vmul.f32 -1.442695, %v1590_v45 }
 0x12c   : > { %v714_v47 = vpop.f32.mrf.mxu2  ;;  %v1242_v54 = vmul.f32 -1.442695, %v1592_v46 }
 0x12d   : > { %v715_v50 = vadd.f32 %v714_v47, %v662_v34  ;;  %v743_v51 = vpop.f32.mrf.mxu3  ;;  %1303 = vpow2.f32 %v1241_v49 }
 0x12e   : > { %v744_v52 = vadd.f32 %v743_v51, %v662_v34 }
 0x12f   : > { %v1595_v53 = vadd.f32 %v764_v48, %v715_v50 }
 0x130   : > { %v1598_v55 = vadd.f32 %v764_v48, %v744_v52 }
 0x131   : > { %v1243_v56 = vmul.f32 -1.442695, %v1595_v53 }
 0x132   : > { %v1244_v57 = vmul.f32 -1.442695, %v1598_v55 }
 0x133   : > { %1305 = vpow2.f32 %v1243_v56  ;;  %v1304_v61 = vpop.eup %1303 }
 0x134   : > { %1307 = vpow2.f32 %v1242_v54  ;;  %v717_v58 = vpop.f32.mrf.mxu2  ;;  %v1604_v2 = vadd.f32 1.0, %v1304_v61 }
 0x135   : > { %v718_v59 = vadd.f32 %v717_v58, %v667_v35  ;;  %v746_v60 = vpop.f32.mrf.mxu3  ;;  %1309 = vpow2.f32 %v1244_v57 }
 0x136   : > { %v747_v63 = vadd.f32 %v746_v60, %v667_v35  ;;  %1311 = vrcp.f32 %v1604_v2  ;;  %vm821_vm4 = vweird.f32 %v1604_v2  ;;  %v827_v42 = vand.u32 2147483648, %v1604_v2 }
 0x137   : > { %v1602_v62 = vadd.f32 %v769_v37, %v718_v59  ;;  %v825_v47 = vand.u32 2147483647, %v1604_v2 }
 0x138   : > { %v1609_v7 = vadd.f32 %v769_v37, %v747_v63  ;;  %v1675_v59 = vor.u32 1.1754944e-38, %v827_v42 }
 0x139   : > { %v1306_v0 = vpop.eup %1305  ;;  %v1245_v3 = vmul.f32 -1.442695, %v1602_v62  ;;  %vm1731_vm3 = vcmp.eq.f32.partialorder %v825_v47, 8.507059e+37 }
 0x13a   : > { %v1308_v1 = vpop.eup %1307  ;;  %v1607_v6 = vadd.f32 1.0, %v1306_v0  ;;  %v1246_v12 = vmul.f32 -1.442695, %v1609_v7 }
 0x13b   : > { %v1310_v4 = vpop.eup %1309  ;;  %v1611_v8 = vadd.f32 1.0, %v1308_v1  ;;  %1313 = vpow2.f32 %v1245_v3 }
 0x13c   : > { %v720_v9 = vpop.f32.mrf.mxu2  ;;  %v1614_v11 = vadd.f32 1.0, %v1310_v4  ;;  %1315 = vrcp.f32 %v1607_v6  ;;  %v1624_v17 = vpop.eup %1311  ;;  %v857_v54 = vand.u32 2147483648, %v1607_v6  ;;  %v855_v60 = vand.u32 2147483647, %v1607_v6 }
 0x13d   : > { %v749_v10 = vpop.f32.mrf.mxu3  ;;  %v721_v13 = vadd.f32 %v720_v9, %v672_v36  ;;  %1317 = vrcp.f32 %v1611_v8  ;;  %v817_v24 = vmul.f32 %v1624_v17, %v1604_v2  ;;  %v840_v51 = vand.u32 2147483647, %v1611_v8 }
 0x13e   : > { %v750_v14 = vadd.f32 %v749_v10, %v672_v36  ;;  %1319 = vpow2.f32 %v1246_v12  ;;  %v842_v52 = vand.u32 2147483648, %v1611_v8  ;;  %vm822_vm5 = vweird.f32 %v1624_v17 }
 0x13f   : > { %v1619_v15 = vadd.f32 %v774_v38, %v721_v13  ;;  %1321 = vrcp.f32 %v1614_v11  ;;  %v818_v31 = vsub.f32 1.0, %v817_v24  ;;  %vm851_vm6 = vweird.f32 %v1607_v6  ;;  %vm1687_vm8 = vmor %vm821_vm4, %vm822_vm5 }
 0x140   : > { %v1621_v16 = vadd.f32 %v774_v38, %v750_v14  ;;  %v858_v9 = vor.u32 1.1754944e-38, %v857_v54  ;;  %v870_v10 = vand.u32 2147483647, %v1614_v11  ;;  %v872_v12 = vand.u32 2147483648, %v1614_v11 }
 0x141   : > { %v1247_v18 = vmul.f32 -1.442695, %v1619_v15  ;;  %v1314_v19 = vpop.eup %1313  ;;  %v819_v39 = vmul.f32 %v1624_v17, %v818_v31  ;;  %vm866_vm9 = vweird.f32 %v1614_v11  ;;  %vm1711_vm13 = vcmp.eq.f32.partialorder %v855_v60, 8.507059e+37 }
 0x142   : > { %v1248_v20 = vmul.f32 -1.442695, %v1621_v16  ;;  %v1628_v21 = vpop.eup %1315  ;;  %v1630_v22 = vadd.f32 1.0, %v1314_v19  ;;  %v843_v4 = vor.u32 1.1754944e-38, %v842_v52 }
 0x143   : > { %v1632_v23 = vpop.eup %1317  ;;  %1323 = vpow2.f32 %v1247_v18  ;;  %v847_v29 = vmul.f32 %v1628_v21, %v1607_v6  ;;  %v1670_v57 = vadd.f32 %v1624_v17, %v819_v39  ;;  %vm852_vm7 = vweird.f32 %v1628_v21 }
 0x144   : > { %v1320_v25 = vpop.eup %1319  ;;  %1325 = vrcp.f32 %v1630_v22  ;;  %v832_v32 = vmul.f32 %v1632_v23, %v1611_v8  ;;  %v887_v13 = vand.u32 2147483648, %v1630_v22  ;;  %vm1707_vm12 = vmor %vm851_vm6, %vm852_vm7  ;;  %vm881_vm14 = vweird.f32 %v1630_v22 }
 0x145   : > { %v1637_v26 = vpop.eup %1321  ;;  %v1641_v30 = vadd.f32 1.0, %v1320_v25  ;;  %1327 = vpow2.f32 %v1248_v20  ;;  %v848_v35 = vsub.f32 1.0, %v847_v29  ;;  %v824_v14 = vsel %vm1687_vm8, %v1624_v17, %v1670_v57 }
 0x146   : > { %v862_v33 = vmul.f32 %v1637_v26, %v1614_v11  ;;  %v833_v40 = vsub.f32 1.0, %v832_v32  ;;  %vm867_vm10 = vweird.f32 %v1637_v26  ;;  %v885_v25 = vand.u32 2147483647, %v1630_v22 }
 0x147   : > { %1329 = vrcp.f32 %v1641_v30  ;;  %v849_v48 = vmul.f32 %v1628_v21, %v848_v35  ;;  %vm896_vm1 = vweird.f32 %v1641_v30  ;;  %v902_v47 = vand.u32 2147483648, %v1641_v30 }
 0x148   : > { %v863_v43 = vsub.f32 1.0, %v862_v33  ;;  %v834_v58 = vmul.f32 %v1632_v23, %v833_v40  ;;  %vm886_vm0 = vcmp.eq.f32.partialorder %v885_v25, 8.507059e+37  ;;  %vm841_vm8 = vcmp.eq.f32.partialorder %v840_v51, 8.507059e+37 }
 0x149   : > { %v1324_v34 = vpop.eup %1323  ;;  %v1680_v0 = vadd.f32 %v1628_v21, %v849_v48 }
 0x14a   : > { %v1648_v36 = vpop.eup %1325  ;;  %v1650_v37 = vadd.f32 1.0, %v1324_v34  ;;  %v864_v61 = vmul.f32 %v1637_v26, %v863_v43  ;;  %v1699_v18 = vadd.f32 %v1632_v23, %v834_v58 }
 0x14b   : > { %v1328_v38 = vpop.eup %1327  ;;  %v877_v41 = vmul.f32 %v1648_v36, %v1630_v22  ;;  %v854_v6 = vsel %vm1707_vm12, %v1628_v21, %v1680_v0  ;;  %vm882_vm15 = vweird.f32 %v1648_v36 }
 0x14c   : > { %1331 = vrcp.f32 %v1650_v37  ;;  %v1662_v49 = vadd.f32 1.0, %v1328_v38  ;;  %v1716_v24 = vadd.f32 %v1637_v26, %v864_v61  ;;  %v917_v34 = vand.u32 2147483648, %v1650_v37  ;;  %vm1739_vm5 = vmor %vm881_vm14, %vm882_vm15 }
 0x14d   : > { %v1658_v44 = vpop.eup %1329  ;;  %v878_v50 = vsub.f32 1.0, %v877_v41  ;;  %v888_v38 = vor.u32 1.1754944e-38, %v887_v13  ;;  %v915_v21 = vand.u32 2147483647, %v1650_v37  ;;  %v900_v41 = vand.u32 2147483647, %v1641_v30 }
 0x14e   : > { %v892_v56 = vmul.f32 %v1658_v44, %v1641_v30  ;;  %1333 = vrcp.f32 %v1662_v49  ;;  %vm897_vm6 = vweird.f32 %v1658_v44  ;;  %vm911_vm7 = vweird.f32 %v1650_v37 }
 0x14f   : > { %v879_v1 = vmul.f32 %v1648_v36, %v878_v50  ;;  %v932_v54 = vand.u32 2147483648, %v1662_v49  ;;  %v918_v22 = vor.u32 1.1754944e-38, %v917_v34  ;;  %v930_v60 = vand.u32 2147483647, %v1662_v49  ;;  %vm1757_vm11 = vmor %vm896_vm1, %vm897_vm6 }
 0x150   : > { %v893_v63 = vsub.f32 1.0, %v892_v56  ;;  %vm916_vm15 = vcmp.eq.f32.partialorder %v915_v21, 8.507059e+37  ;;  %vm926_vm2 = vweird.f32 %v1662_v49  ;;  %v859_v30 = vsel %vm1711_vm13, %v858_v9, %v854_v6 }
 0x151   : > { %v880_v33 = vadd.f32 %v1648_v36, %v879_v1  ;;  %v933_v13 = vor.u32 1.1754944e-38, %v932_v54  ;;  %v938_v17 = vmul.f32 %v859_v30, %v1595_v53  ;;  %vm951_vm13 = vcmask 261120  }
 0x152   : > { %v1332_v3 = vpop.eup %1331  ;;  %v894_v29 = vmul.f32 %v1658_v44, %v893_v63  ;;  %v1005_v34 = vstv %s570_s28 }
 0x153   : > { %v907_v2 = vmul.f32 %v1332_v3, %v1650_v37  ;;  %vm912_vm4 = vweird.f32 %v1332_v3  ;;  %v884_v56 = vsel %vm1739_vm5, %v1648_v36, %v880_v33 }
 0x154   : > { %v1334_v31 = vpop.eup %1333  ;;  %v895_v48 = vadd.f32 %v1658_v44, %v894_v29  ;;  %vm913_vm12 = vmor %vm911_vm7, %vm912_vm4 }
 0x155   : > { %v908_v32 = vsub.f32 1.0, %v907_v2  ;;  %v922_v35 = vmul.f32 %v1334_v31, %v1662_v49  ;;  %vm927_vm14 = vweird.f32 %v1334_v31  ;;  %vm1765_vm4 = vmor %vm866_vm9, %vm867_vm10  ;;  %v889_v49 = vsel %vm886_vm0, %v888_v38, %v884_v56 }
 0x156   : > { %v899_v1 = vsel %vm1757_vm11, %v1658_v44, %v895_v48  ;;  %vm928_vm1 = vmor %vm926_vm2, %vm927_vm14  ;;  %v903_v2 = vor.u32 1.1754944e-38, %v902_v47  ;;  %v869_v19 = vsel %vm1765_vm4, %v1637_v26, %v1716_v24  ;;  %vm931_vm9 = vcmp.eq.f32.partialorder %v930_v60, 8.507059e+37 }
 0x157   : > { %v909_v40 = vmul.f32 %v1332_v3, %v908_v32  ;;  %v923_v42 = vsub.f32 1.0, %v922_v35  ;;  %vm901_vm10 = vcmp.eq.f32.partialorder %v900_v41, 8.507059e+37  ;;  %vm1871_vm0 = vweird.f32 %v1632_v23 }
 0x158   : > { %vm1872_vm11 = vweird.f32 %v1611_v8  ;;  %v940_v20 = vmul.f32 %v889_v49, %v1602_v62  ;;  %v904_v29 = vsel %vm901_vm10, %v903_v2, %v899_v1  ;;  %v829_v26 = vsel %vm1731_vm3, %v1675_v59, %v824_v14  ;;  %v1016_v8 = vld.sshfl [vmem:[#allocation1] sm:$0xff pattern:$0x75316420]  ;;  %v1017_v14 = vld.sshfl [vmem:[#allocation1 + $0x8] sm:$0xff pattern:$0x75316420] }
 0x159   : > { %v910_v50 = vadd.f32 %v1332_v3, %v909_v40  ;;  %v924_v58 = vmul.f32 %v1334_v31, %v923_v42  ;;  %vm1783_vm5 = vmor %vm1872_vm11, %vm1871_vm0  ;;  %vm871_vm2 = vcmp.eq.f32.partialorder %v870_v10, 8.507059e+37  ;;  %v941_v57 = vmul.f32 %v904_v29, %v1609_v7  ;;  %v949_v7 = vpop.permute.xlu0 %948 }
 0x15a   : > { %v839_v24 = vsel %vm1783_vm5, %v1632_v23, %v1699_v18  ;;  %v936_v11 = vmul.f32 %v829_v26, %v1590_v45  ;;  %vm1875_vm3 = vcmask 1043456  }
 0x15b   : > { %v914_v61 = vsel %vm913_vm12, %v1332_v3, %v910_v50  ;;  %v925_v0 = vadd.f32 %v1334_v31, %v924_v58  ;;  %v844_v23 = vsel %vm841_vm8, %v843_v4, %v839_v24  ;;  %vm1876_vm6 = vmmov %vm1875_vm3 }
 0x15c   : > { %v919_v63 = vsel %vm916_vm15, %v918_v22, %v914_v61  ;;  %v937_v53 = vmul.f32 %v844_v23, %v1592_v46  ;;  %vm1877_vm7 = vmmov %vm1875_vm3  ;;  %vm1036_vm15 = vcmask 0  }
 0x15d   : > { %v942_v3 = vmul.f32 %v919_v63, %v1619_v15  ;;  %v929_v25 = vsel %vm928_vm1, %v1334_v31, %v925_v0  ;;  %v873_v15 = vor.u32 1.1754944e-38, %v872_v12  ;;  %vm1878_vm12 = vmmov %vm1875_vm3 }
 0x15e   : > { %v934_v9 = vsel %vm931_vm9, %v933_v13, %v929_v25  ;;  %vm1879_vm14 = vmmov %vm1875_vm3 }
 0x15f   : > { %967 = vmatpush.msra.mxu0 %v942_v3  ;;  %v943_v62 = vmul.f32 %v934_v9, %v1621_v16  ;;  %v874_v12 = vsel %vm871_vm2, %v873_v15, %v869_v19  ;;  %v944_v16 = vld [vmem:[%s1850_s10] sm:$0xf] }
 0x160   : > { %v939_v52 = vmul.f32 %v874_v12, %v1598_v55 }
 0x161   : > { %968 = vmatpush.msra.mxu0 %v940_v20  ;;  %987 = vmatpush.msra.mxu1 %v943_v62 }
 0x163   : > { %969 = vmatpush.msra.mxu0 %v938_v17  ;;  %988 = vmatpush.msra.mxu1 %v941_v57 }
 0x165   : > { %970 = vmatpush.msra.mxu0 %v936_v11  ;;  %989 = vmatpush.msra.mxu1 %v939_v52 }
 0x166   : > { %1249 = vmatmul.msk.f32.vlgmr.msra.gmra.mxu0 %vm951_vm13, %v944_v16 }
 0x167   : > { %990 = vmatpush.msra.mxu1 %v937_v53 }
 0x168   : > { %1250 = vmatmul.msk.f32.vlgmr.msra.gmra.mxu1 %vm951_vm13, %v944_v16 }
 0x1e3   : > { %v972_v45 = vpop.f32.mrf.mxu0 }
 0x1e4   : > { %v973_v51 = vadd.f32 %v972_v45, %v949_v7 }
 0x1e5   : > { %v992_v10 = vpop.f32.mrf.mxu1 }
 0x1e6   : > { %v1001_v59 = vmul.f32 %v973_v51, %v1535_v5  ;;  %v1020_v18 = vsub.f32 %v973_v51, %v1016_v8  ;;  %v993_v55 = vadd.f32 %v992_v10, %v949_v7 }
 0x1e8   : > { %v1022_v31 = vmul.f32 %v1020_v18, %v1020_v18  ;;  %v997_v46 = vrot.slane %v993_v55, 4  ;;  %v1002_v6 = vmul.f32 %v993_v55, %v1535_v5  ;;  %v1021_v32 = vsub.f32 %v993_v55, %v1017_v14 }
 0x1e9   : > { %v1003_v33 = vsub.f32 %v1558_v27, %v1001_v59 }
 0x1ea   : > { %v998_v35 = vsel %vm1875_vm3, %v973_v51, %v997_v46  ;;  %v1004_v38 = vsub.f32 %v1560_v28, %v1002_v6  ;;  %v1023_v39 = vmul.f32 %v1021_v32, %v1021_v32  ;;  %v1024_v40 = vsel %vm1876_vm6, %v1022_v31, 0.0 }
 0x1eb   : > { %1000 = vst [vmem:[%s559_s16] sm:$0xff] %v998_v35  ;;  %v1006_v43 = vmul.f32 %v1005_v34, %v1003_v33 }
 0x1ec   : > { %v1007_v21 = vmul.f32 %v1005_v34, %v1004_v38  ;;  %v1025_v41 = vsel %vm1877_vm7, %v1023_v39, 0.0 }
 0x1ed   : > { %v1026_v42 = vadd.f32 %v1025_v41, %v1024_v40 }
 0x1ee   : > { %v1010_v5 = vrot.slane %v1007_v21, 4 }
 0x1ef   : > { %1027 = vadd.xlane.f32.xlu1 %v1026_v42 }
 0x1f0   : > { %v1011_v27 = vsel %vm1878_vm12, %v1006_v43, %v1010_v5 }
 0x1f1   : > { %1013 = vst [vmem:[%s564_s21] sm:$0xff] %v1011_v27 }
 0x262   : > { %v1028_v28 = vpop.xlane.xlu1 %1027 }
 0x263   : > { %v1029_v48 = vsel %vm1879_vm14, %v1028_v28, 0.0 }
 0x264   : > { %v1030_v47 = vrot.slane %v1029_v48, 4 }
 0x266   : > { %v1031_v50 = vadd.f32 %v1030_v47, %v1029_v48 }
 0x268   : > { %v1032_v54 = vrot.slane %v1031_v50, 2 }
 0x26a   : > { %v1033_v56 = vadd.f32 %v1032_v54, %v1031_v50 }
 0x26c   : > { %v1034_v22 = vrot.slane %v1033_v56, 1 }
 0x26e   : > { %v1035_v58 = vadd.f32 %v1034_v22, %v1033_v56 }
 0x270   : > { %1037 = vst.msk [vmem:[%s567_s24] sm:$0x1] %vm1036_vm15, %v1035_v58 }
 0x271 PF: > { %s27_s29 = sadd.s32 1, %s1394_s29  }
 0x272   : > { %p24_p7 = scmp.ge.s32.totalorder %s27_s29, 4  }
 0x274   :  { %26 = sbr.rel (!%p24_p7) target bundleno = 2 (0x2), region = 141 }
 0x279   :  { %1087 = vsyncpa [#allocation3], 1 }
 0x27a   :  { %1089 = vsyncpa [#allocation3 + $0x1], 1 }
 0x27b   :  { %1090 = vsyncpa [#allocation5], 1 }

</bundles_post_ra>
